<compile_context>
chip_gen: v7x
topology: tpu7x:2x2x1
jax: 0.10.0
libtpu: 0.0.40
codegen_flags: <defaults>
</compile_context>

<pallas_src>
import functools

import jax
import jax.numpy as jnp
from jax.experimental import pallas as pl
from jax.experimental.pallas import tpu as pltpu


def _round_up(v, m):
    return (v + m - 1) // m * m


def _vmem_capacity_bytes():
    """Physical VMEM per core; conservative v7x fallback if unqueryable."""
    try:
        return int(pltpu.get_tpu_info().vmem_capacity_bytes)
    except Exception:
        return 64 * 1024 * 1024


def _linear_kernel(x_ref, w_ref, b_ref, o_ref):
    """One (tm, tn) output tile: full-K matmul (f32 accum on MXU) + f32 bias."""
    x = x_ref[...].astype(w_ref.dtype)  # bf16 feed -> full-rate MXU (no-op if f32)
    acc = jnp.dot(x, w_ref[...], preferred_element_type=jnp.float32)
    o_ref[...] = (acc + b_ref[...]).astype(o_ref.dtype)


def _choose_tiles(M, K, N, x_bytes, w_bytes, budget_bytes):
    """Pick (tm, tn) fitting the double-buffered VMEM budget, >=4 grid steps."""
    tm = min(_round_up(M, 8), 256)
    tn = min(_round_up(N, 128), 512)

    def footprint(tm_, tn_):
        # double-buffered x tile, w tile, f32 bias tile, output tile (x dtype)
        return 2 * (tm_ * K * x_bytes + K * tn_ * w_bytes + tn_ * 4
                    + tm_ * tn_ * x_bytes)

    # Shrink tm first (classifier x tiles are cheap), keep tn >= 256 if we can
    # (v6e/v7x MXU is 256 lanes wide), only then drop to 128.
    while footprint(tm, tn) > budget_bytes and tm > 8:
        tm = max(8, _round_up(tm // 2, 8))
    while footprint(tm, tn) > budget_bytes and tn > 256:
        tn = max(256, (tn // 2 // 128) * 128)
    if footprint(tm, tn) > budget_bytes and tn > 128:
        tn = 128
    # TODO(synk): for extremely large feat_dim where even a (K, 128) tile does
    # not fit in VMEM, a K-tiled reduction grid would be required; classifier
    # heads (K up to a few thousand) never hit that.

    # Aim for >= 4 grid steps: hides the weight-tile DMA behind compute and
    # gives both v7x TensorCores (and the pipeline) work for small heads.
    def steps(tm_, tn_):
        return pl.cdiv(M, tm_) * pl.cdiv(N, tn_)

    while steps(tm, tn) < 4 and tn > 256:
        tn = max(256, (tn // 2 // 128) * 128)
    while steps(tm, tn) < 4 and tm > 8:
        new_tm = max(8, _round_up(tm // 2, 8))
        if new_tm == tm:
            break
        tm = new_tm
    return tm, tn


def prepare_classifier_params(w_pt, b, weight_dtype=jnp.bfloat16):
    """One-time parameter prep (hoisted out of the per-call path).

    w_pt: PyTorch-layout weight (num_classes, feat_dim); b: (num_classes,).
    Returns (w_prepped, b_prepped): (feat_dim, N_pad) weight in weight_dtype and
    (1, N_pad) f32 bias, with N padded to a multiple of 512 so every weight /
    bias block the kernel reads is fully valid regardless of the chosen tn.
    """
    num_classes, feat_dim = w_pt.shape
    n_pad = _round_up(num_classes, 512)
    w_t = jnp.transpose(w_pt).astype(weight_dtype)  # (K, N)
    b_p = b.astype(jnp.float32)
    if n_pad != num_classes:
        w_t = jnp.pad(w_t, ((0, 0), (0, n_pad - num_classes)))
        b_p = jnp.pad(b_p, (0, n_pad - num_classes))
    return w_t, b_p.reshape(1, n_pad)


@functools.partial(jax.jit, static_argnames=("num_classes",))
def dot_product_classifier(x, w_prepped, b_prepped, *, num_classes):
    """y = x @ W.T + b with x:(M,K) and prepared (padded/cast) parameters."""
    M, K = x.shape
    K2, n_pad = w_prepped.shape
    assert K == K2, "feature dims must match"
    N = num_classes

    x_bytes = jnp.dtype(x.dtype).itemsize
    w_bytes = jnp.dtype(w_prepped.dtype).itemsize

    vmem_cap = _vmem_capacity_bytes()
    budget = int(0.6 * vmem_cap)            # ~38 MiB on v7x, ~76 MiB on v5e/v6e
    tm, tn = _choose_tiles(M, K, N, x_bytes, w_bytes, budget)

    n_m = pl.cdiv(M, tm)
    n_n = pl.cdiv(N, tn)

    footprint = 2 * (tm * K * x_bytes + K * tn * w_bytes + tn * 4
                     + tm * tn * x_bytes)
    vmem_limit = int(min(footprint + (16 << 20), int(0.75 * vmem_cap)))

    # Pick the grid order so the larger operand is streamed from HBM once and
    # its tile is revisited (same block index) across the inner axis.
    w_total = K * n_pad * w_bytes
    x_total = M * K * x_bytes
    if w_total >= x_total:
        # N outer, M inner: each weight tile loaded once, stays resident.
        grid = (n_n, n_m)
        x_spec = pl.BlockSpec((tm, K), lambda j, i: (i, 0))
        w_spec = pl.BlockSpec((K, tn), lambda j, i: (0, j))
        b_spec = pl.BlockSpec((1, tn), lambda j, i: (0, j))
        o_spec = pl.BlockSpec((tm, tn), lambda j, i: (i, j))
    else:
        # M outer, N inner: each x tile loaded once, stays resident.
        grid = (n_m, n_n)
        x_spec = pl.BlockSpec((tm, K), lambda i, j: (i, 0))
        w_spec = pl.BlockSpec((K, tn), lambda i, j: (0, j))
        b_spec = pl.BlockSpec((1, tn), lambda i, j: (0, j))
        o_spec = pl.BlockSpec((tm, tn), lambda i, j: (i, j))

    return pl.pallas_call(
        _linear_kernel,
        out_shape=jax.ShapeDtypeStruct((M, N), x.dtype),
        grid_spec=pltpu.PrefetchScalarGridSpec(
            num_scalar_prefetch=0,
            grid=grid,
            in_specs=[x_spec, w_spec, b_spec],
            out_specs=o_spec,
        ),
        compiler_params=pltpu.CompilerParams(
            dimension_semantics=("parallel", "parallel"),
            vmem_limit_bytes=vmem_limit,
        ),
    )(x, w_prepped, b_prepped)


if __name__ == "__main__":
    # Small shapes consistent with the module: batch=16, feat_dim=256,
    # num_classes=1000 (exercises ragged N blocks + multi-step parallel grid).
    B, feat_dim, num_classes = 16, 256, 1000

    key = jax.random.PRNGKey(0)
    kx, kw, kb = jax.random.split(key, 3)

    x = jax.random.normal(kx, (B, feat_dim), dtype=jnp.float32)
    # PyTorch nn.Linear weight layout: (num_classes, feat_dim).
    w_pt = jax.random.normal(kw, (num_classes, feat_dim), dtype=jnp.float32) * 0.02
    b = jax.random.normal(kb, (num_classes,), dtype=jnp.float32) * 0.01

    # One-time parameter prep (transpose + pad + bf16 cast) — hoisted.
    w_prep, b_prep = prepare_classifier_params(w_pt, b, weight_dtype=jnp.bfloat16)

    y = dot_product_classifier(x, w_prep, b_prep, num_classes=num_classes)
    y = jax.block_until_ready(y)

    # Matched-precision reference: same bf16 operands, f32 accumulation + bias.
    y_ref = (
        jnp.dot(x.astype(jnp.bfloat16), w_pt.T.astype(jnp.bfloat16),
                preferred_element_type=jnp.float32)
        + b
    )
    assert y.shape == (B, num_classes)
    assert jnp.allclose(y, y_ref, atol=5e-3, rtol=5e-3), "mismatch vs reference"

    print("KERNEL_OK")
</pallas_src>

<mosaic_0001>
module attributes {stable_mosaic.version = 11 : i64} {
  func.func @_linear_kernel(%arg0: i32, %arg1: i32, %arg2: memref<16x256xf32, #tpu.memory_space<vmem>>, %arg3: memref<256x256xbf16, #tpu.memory_space<vmem>>, %arg4: memref<1x256xf32, #tpu.memory_space<vmem>>, %arg5: memref<16x256xf32, #tpu.memory_space<vmem>>) attributes {dimension_semantics = [#tpu.dimension_semantics<parallel>, #tpu.dimension_semantics<parallel>], iteration_bounds = array<i64: 4, 1>, scalar_prefetch = 0 : i64, scratch_operands = 0 : i64, tpu.core_type = #tpu.core_type<tc>, window_params = [{transform_indices = @transform_0, window_bounds = array<i64: 16, 256>}, {transform_indices = @transform_1, window_bounds = array<i64: 256, 256>}, {transform_indices = @transform_2, window_bounds = array<i64: 1, 256>}, {transform_indices = @transform_3, window_bounds = array<i64: 16, 256>}]} {
    %c0 = arith.constant 0 : index
    %c0_0 = arith.constant 0 : index
    %0 = vector.load %arg2[%c0, %c0_0] : memref<16x256xf32, #tpu.memory_space<vmem>>, vector<16x256xf32>
    %1 = arith.truncf %0 : vector<16x256xf32> to vector<16x256xbf16>
    %c0_1 = arith.constant 0 : index
    %c0_2 = arith.constant 0 : index
    %2 = vector.load %arg3[%c0_1, %c0_2] : memref<256x256xbf16, #tpu.memory_space<vmem>>, vector<256x256xbf16>
    %cst = arith.constant dense<0.000000e+00> : vector<16x256xf32>
    %3 = tpu.matmul %1, %2, %cst {dimension_numbers = #tpu.dot_dimension_numbers<[1], [0], [0], [1], [0, 0, 1, 1], [], []>} : vector<16x256xbf16>, vector<256x256xbf16>, vector<16x256xf32> -> vector<16x256xf32>
    %c0_3 = arith.constant 0 : index
    %c0_4 = arith.constant 0 : index
    %4 = vector.load %arg4[%c0_3, %c0_4] : memref<1x256xf32, #tpu.memory_space<vmem>>, vector<1x256xf32>
    %5 = vector.broadcast %4 : vector<1x256xf32> to vector<16x256xf32>
    %6 = arith.addf %3, %5 : vector<16x256xf32>
    %c0_5 = arith.constant 0 : index
    %c0_6 = arith.constant 0 : index
    %7 = vector.load %arg5[%c0_5, %c0_6] : memref<16x256xf32, #tpu.memory_space<vmem>>, vector<16x256xf32>
    tpu.vector_store %arg5[%c0_5, %c0_6], %6 {strides = array<i32>} : memref<16x256xf32, #tpu.memory_space<vmem>>, vector<16x256xf32>,
    return
  }
  func.func @transform_0(%arg0: i32, %arg1: i32) -> (i32, i32) {
    %c0_i32 = arith.constant 0 : i32
    %c0_i32_0 = arith.constant 0 : i32
    return %arg1, %c0_i32 : i32, i32
  }
  func.func @transform_1(%arg0: i32, %arg1: i32) -> (i32, i32) {
    %c0_i32 = arith.constant 0 : i32
    %c0_i32_0 = arith.constant 0 : i32
    return %c0_i32, %arg0 : i32, i32
  }
  func.func @transform_2(%arg0: i32, %arg1: i32) -> (i32, i32) {
    %c0_i32 = arith.constant 0 : i32
    %c0_i32_0 = arith.constant 0 : i32
    return %c0_i32, %arg0 : i32, i32
  }
  func.func @transform_3(%arg0: i32, %arg1: i32) -> (i32, i32) {
    %c0_i32 = arith.constant 0 : i32
    return %arg1, %arg0 : i32, i32
  }
}

</mosaic_0001>

<bundles_post_ra>
// kernel: dot_product_classifier.1
= control target key start
LH: loop header
LB: loop body
LE: loop exit
PB: predicated region body
PF: predicated region fallthrough
CT: control target
= control target key end

     0   :  { %s1348_s0 = inlined_call_operand.hbm [shape: f32[16,256], index: 0, kind: input, shape index: {}]   ;;  %s1349_s1 = inlined_call_operand.hbm [shape: bf16[256,1024], index: 1, kind: input, shape index: {}]   ;;  %s1350_s2 = inlined_call_operand.hbm [shape: f32[1,1024], index: 2, kind: input, shape index: {}]   ;;  %s1351_s3 = inlined_call_operand.hbm [shape: f32[16,1000], index: 3, kind: output, shape index: {}]  }
   0x1   :  { %1360 = sst [smem:[#allocation13_spill]] %s1349_s1 }
   0x2   :  { %8 = vsyncpa [#allocation3], 0 }
   0x3   :  { %9 = vsyncpa [#allocation6], 0 }
   0x4   :  { %11 = vsyncpa [#allocation6 + $0x1], 0 }
   0x5   :  { %12 = vsyncpa [#allocation4], 0 }
   0x6   :  { %14 = vsyncpa [#allocation4 + $0x1], 0  ;;  %s1057_s12 = smov 0   ;;  %s1059_s13 = smov 0  }
   0x7   :  { %s1061_s14 = smov 0   ;;  %s1063_s15 = smov 0  }
   0x8   :  { %s1065_s16 = smov 0   ;;  %s1067_s17 = smov 0  }
   0x9 LB: > { %s32_s18 = sadd.s32 1, %s1019_s16  ;;  %s65_s19 = sadd.s32 1, %s1011_s14  ;;  %s1023_s17 = sphi %s1067_s17, %s20_s17   ;;  %s1019_s16 = sphi %s1065_s16, %s1383_s16   ;;  %s1015_s15 = sphi %s1063_s15, %s1382_s15   ;;  %s1011_s14 = sphi %s1061_s14, %s1381_s14   ;;  %s1007_s13 = sphi %s1059_s13, %s1380_s13   ;;  %s1003_s12 = sphi %s1057_s12, %s1379_s12  }
   0xa   : > { %p34_p0 = scmp.ge.s32.totalorder %s32_s18, 4  ;;  %p72_p1 = scmp.ne.s32.totalorder %s1011_s14, %s1007_s13 }
   0xb   : > { %p73_p2 = scmp.eq.s32.totalorder %s1023_s17, 0  ;;  %p741_p4 = scmp.lt.s32.totalorder %s1023_s17, 4 }
   0xc   : > { %s1385_s18 = smov (%p34_p0, %s32_s18), 0  ;;  %s173_s21 = sand.u32 1, %s1023_s17  }
   0xd   : > { %1361 = sst [smem:[#allocation12_spill]] %s1385_s18  ;;  %p74_p3 = por %p73_p2, %p72_p1 }
   0xe   : > { %s62_s20 = ssub.s32 %s1019_s16, %s1385_s18  ;;  %s175_s22 = sand.u32 1, %s1011_s14  }
   0xf   : > { %p63_p5 = scmp.eq.s32.totalorder %s62_s20, 0  ;;  %s712_s23 = sshll.u32 %s1019_s16, 7 }
  0x10   : > { %s664_s25 = sshll.u32 %s175_s22, 8  ;;  %s1362_s1 = sld [smem:[#allocation13_spill]] }
  0x11   : > { %s1104_s24 = scalar_select %p63_p5, %s1011_s14, %s65_s19  }
  0x12   : > { %p1113_p6 = pnand %p741_p4, %p74_p3  ;;  %s177_s30 = scalar_lea.vmem [#allocation5], %s664_s25 }
  0x13   : > { %s184_s4 = sshll.u32 %s177_s30, 4  ;;  %s1119_s5 = scalar_lea.sflag [#allocation6], %s173_s21  ;;  %s1117_s4 = int_to_ptr.vmem [resolvable:$true] %s184_s4 }
  0x14   : > { %s1363_s29 = scalar_select %p1113_p6, 1, 0 }
  0x15   : > { %p1354_p8 = pneg %p1113_p6 }
  0x16   : > { %s1111_s28 = scalar_lea.hbm %s1362_s1, %s712_s23  ;;  %s854_s9 = scalar_lea.hbm %s1362_s1, 16384 }
  0x17   : > { %s849_s6 = scalar_lea.hbm %s1111_s28, 4096  ;;  %p855_p11 = scmp.lt.u32.totalorder %s1111_s28, %s1362_s1 }
  0x18   : > { %p850_p7 = scmp.ne.s32.totalorder %s1111_s28, %s849_s6  ;;  %p856_p12 = scmp.lt.u32.totalorder %s854_s9, %s849_s6 }
  0x19   : > { %p858_p0 = scmp.lt.u32.totalorder %s849_s6, %s1111_s28 }
  0x1a   : > { %p852_p9 = pnand %p1354_p8, %p850_p7  ;;  %p857_p13 = por %p856_p12, %p855_p11 }
  0x1c   : > { %p853_p10 = pneg %p852_p9  ;;  %p859_p2 = por %p858_p0, %p857_p13 }
  0x1e   : > { %p860_p3 = pnand %p859_p2, %p853_p10 }
  0x20   : > { %863 = shalt.err (!%p860_p3)
}
  0x21   : > { %s864_s19 = scalar_lea.vmem %s1117_s4, 4096  ;;  %s1025_s20 = smov [#allocation5]  }
  0x22   : > { %p865_p4 = scmp.ne.s32.totalorder %s1117_s4, %s864_s19  ;;  %s869_s21 = sshll.u32 %s1025_s20, 4  ;;  %s870_s21 = int_to_ptr.vmem [resolvable:$false] %s869_s21 }
  0x23   : > { %s871_s23 = scalar_lea.vmem %s870_s21, 8192  ;;  %p872_p9 = scmp.lt.s32.totalorder %s1117_s4, %s870_s21 }
  0x24   : > { %p867_p5 = pnand %p865_p4, %p1354_p8  ;;  %p873_p11 = scmp.lt.s32.totalorder %s871_s23, %s864_s19 }
  0x26   : > { %p868_p7 = pneg %p867_p5  ;;  %p874_p12 = por %p873_p11, %p872_p9 }
  0x28   : > { %p875_p13 = pnand %p874_p12, %p868_p7 }
  0x2a   : > { %878 = shalt.err (!%p875_p13)
}
  0x2b   : > { %s1026_s25 = smov 512   ;;  %s1027_s26 = smov 128  }
  0x2c   : > { %s1028_s27 = smov 8   ;;  %s1148_s30 = sadd.s32 4294967295, %s1023_s17  }
  0x2d   : > { %732 = dma.hbm_to_vmem [thread:$0]  (!%p1113_p6), %s1111_s28, 4096, %s1117_s4, %s1119_s5, %s1026_s25, %s1027_s26, %s1028_s27  }
  0x2e   : > { %s660_s6 = sadd.s32 4294967294, %s1023_s17   ;;  %p78_p10 = scmp.ne.s32.totalorder %s1007_s13, %s1003_s12 }
  0x2f   : > { %p1353_p0 = scmp.eq.s32.totalorder %s1148_s30, 0  ;;  %p130_p2 = scmp.eq.s32.totalorder %s1148_s30, 3 }
  0x30   : > { %p136_p3 = scmp.eq.s32.totalorder %s660_s6, 3  ;;  %p661_p5 = scmp.ge.s32.totalorder %s1023_s17, 1 }
  0x31   : > { %p1157_p4 = por %p1353_p0, %p78_p10  ;;  %p1165_p7 = por %p130_p2, %p72_p1 }
  0x32   : > { %p1169_p9 = por %p136_p3, %p78_p10  ;;  %p143_p11 = scmp.lt.s32.totalorder %s1023_s17, 5 }
  0x33   : > { %s1364_s7 = scalar_select %p1157_p4, 1, 0 }
  0x34   : > { %s1365_s28 = scalar_select %p1165_p7, 1, 0 }
  0x35   : > { %s1366_s4 = scalar_select %p1169_p9, 1, 0 }
  0x36   : > { %p1174_p12 = pnand %p661_p5, %p143_p11  ;;  %s1029_s9 = smov [#allocation2]  }
  0x37   : > { %s159_s10 = sshll.u32 %s1029_s9, 4  ;;  %s667_s11 = sshll.u32 %s175_s22, 1  ;;  %s1178_s10 = int_to_ptr.vmem [resolvable:$true] %s159_s10 }
  0x38   : > { %s1367_s8 = scalar_select %p1174_p12, 1, 0 }
  0x39   : > { %p725_p13 = pneg %p1174_p12  ;;  %s713_s19 = sshll.u32 %s1019_s16, 5 }
  0x3a   : > { %s1194_s25 = scalar_lea.hbm %s1350_s2, %s713_s19  ;;  %s198_s26 = scalar_lea.vmem [#allocation7], %s667_s11 }
  0x3b   : > { %p1187_p1 = pnand %p725_p13, %p1353_p0  ;;  %s206_s27 = sshll.u32 %s198_s26, 4  ;;  %s1196_s27 = int_to_ptr.vmem [resolvable:$true] %s206_s27 }
  0x3c   : > { %s879_s22 = scalar_lea.hbm %s1348_s0, 512 }
  0x3d   : > { %p880_p10 = scmp.ne.s32.totalorder %s1348_s0, %s879_s22  ;;  %p881_p2 = pneg %p1187_p1 }
  0x3e   : > { %p886_p11 = scmp.lt.u32.totalorder %s879_s22, %s1348_s0 }
  0x3f   : > { %p882_p3 = pnand %p881_p2, %p880_p10 }
  0x41   : > { %p883_p5 = pneg %p882_p3 }
  0x43   : > { %p888_p13 = pnand %p886_p11, %p883_p5 }
  0x45   : > { %891 = shalt.err (!%p888_p13)
}
  0x46   : > { %s892_s11 = scalar_lea.vmem %s1178_s10, 512  ;;  %p900_p7 = scmp.lt.s32.totalorder %s1178_s10, %s1178_s10 }
  0x47   : > { %p893_p0 = scmp.ne.s32.totalorder %s1178_s10, %s892_s11  ;;  %p901_p4 = scmp.lt.s32.totalorder %s892_s11, %s892_s11 }
  0x49   : > { %p895_p8 = pnand %p893_p0, %p881_p2  ;;  %p902_p12 = por %p901_p4, %p900_p7 }
  0x4b   : > { %p896_p9 = pneg %p895_p8 }
  0x4d   : > { %p903_p6 = pnand %p902_p12, %p896_p9 }
  0x4f   : > { %906 = shalt.err (!%p903_p6)
}
  0x50   : > { %s1030_s1 = smov 256   ;;  %s1031_s18 = smov 16  }
  0x51   : > { %728 = dma.hbm_to_vmem [thread:$0]  (!%p1187_p1), %s1348_s0, 512, %s1178_s10, [#allocation3], %s1030_s1, %s1030_s1, %s1031_s18  }
  0x52   : > { %s907_s6 = scalar_lea.hbm %s1194_s25, 32  ;;  %p1369_p0 = scmp.ne.s32.totalorder %s1363_s29, 0 }
  0x53   : > { %p908_p8 = scmp.ne.s32.totalorder %s1194_s25, %s907_s6  ;;  %s912_s21 = scalar_lea.hbm %s1350_s2, 128 }
  0x54   : > { %p1370_p4 = pneg %p1369_p0  ;;  %p913_p9 = scmp.lt.u32.totalorder %s1194_s25, %s1350_s2 }
  0x55   : > { %p914_p12 = scmp.lt.u32.totalorder %s912_s21, %s907_s6  ;;  %p916_p2 = scmp.lt.u32.totalorder %s907_s6, %s1194_s25 }
  0x56   : > { %p910_p7 = pnand %p908_p8, %p1370_p4 }
  0x57   : > { %p915_p10 = por %p914_p12, %p913_p9 }
  0x58   : > { %p911_p6 = pneg %p910_p7 }
  0x59   : > { %p917_p3 = por %p916_p2, %p915_p10 }
  0x5b   : > { %p918_p5 = pnand %p917_p3, %p911_p6 }
  0x5d   : > { %921 = shalt.err (!%p918_p5)
}
  0x5e   : > { %s922_s10 = scalar_lea.vmem %s1196_s27, 32  ;;  %p1371_p11 = pmov %p1370_p4 }
  0x5f   : > { %p923_p1 = scmp.ne.s32.totalorder %s1196_s27, %s922_s10  ;;  %s1032_s20 = smov [#allocation7]  }
  0x60   : > { %s927_s1 = sshll.u32 %s1032_s20, 4  ;;  %s928_s1 = int_to_ptr.vmem [resolvable:$false] %s927_s1 }
  0x61   : > { %p925_p13 = pnand %p923_p1, %p1371_p11  ;;  %s929_s18 = scalar_lea.vmem %s928_s1, 64 }
  0x62   : > { %p930_p4 = scmp.lt.s32.totalorder %s1196_s27, %s928_s1  ;;  %p931_p7 = scmp.lt.s32.totalorder %s929_s18, %s922_s10 }
  0x63   : > { %p926_p8 = pneg %p925_p13 }
  0x64   : > { %p932_p9 = por %p931_p7, %p930_p4 }
  0x66   : > { %p933_p12 = pnand %p932_p9, %p926_p8 }
  0x68   : > { %936 = shalt.err (!%p933_p12)
}
  0x69   : > { %735 = dma.hbm_to_vmem [thread:$0]  (!%p1369_p0), %s1194_s25, 32, %s1196_s27, %s1119_s5  }
  0x6a   : > { %p1372_p6 = scmp.ne.s32.totalorder %s1367_s8, 0 }
  0x6b   : > { %p1373_p10 = scmp.eq.s32.totalorder (!%p1372_p6), %s1148_s30, 0 }
  0x6c   : > { %215 = sbr.rel (%p1372_p6) target bundleno = 419 (0x1a3), region = 32 }
  0x73   : > { %990 = dma.done.wait (%p1373_p10), [#allocation3], 512   ;;  %p1374_p2 = pmov %p1373_p10 }
  0x74   : > { %s221_s19 = sand.u32 1, %s1148_s30   ;;  %s1251_s26 = sand.u32 1, %s1007_s13  }
  0x75   : > { %992 = vsyncadd (%p1374_p2), [#allocation3], 4294966784  ;;  %s672_s29 = sshll.u32 %s1251_s26, 8  ;;  %s222_s6 = scalar_lea.sflag [#allocation6], %s221_s19 }
  0x76   : > { %s1254_s9 = scalar_lea.vmem [#allocation5], %s672_s29  ;;  %p1375_p0 = scmp.ne.s32.totalorder %s1364_s7, 0 }
  0x78   : > { %994 = dma.done.wait (%p1375_p0), %s222_s6, 4128  }
  0x79   : > { %996 = vsyncadd (%p1375_p0), %s222_s6, 4294963168  ;;  %v801_v0 = vld [vmem:[%s1254_s9 + $0x4] ss:$8 sps:$4 sm:$0xff]   ;;  %v803_v1 = vld [vmem:[%s1254_s9] ss:$8 sps:$4 sm:$0xff]   ;;  %v307_v38 = vlaneseq  ;;  %s673_s5 = sshll.u32 %s1251_s26, 1 }
  0x7a   : > { %477 = vmatprep.subr.bf16.mxu0 %v801_v0  ;;  %v804_v2 = vld [vmem:[%s1254_s9 + $0x14] ss:$8 sps:$4 sm:$0xff]   ;;  %v806_v3 = vld [vmem:[%s1254_s9 + $0x10] ss:$8 sps:$4 sm:$0xff]   ;;  %v807_v4 = vld [vmem:[%s1254_s9 + $0x24] ss:$8 sps:$4 sm:$0xff]  }
  0x7b   : > { %478 = vmatpush1.bf16.msra.mxu0 %v803_v1  ;;  %v809_v5 = vld [vmem:[%s1254_s9 + $0x20] ss:$8 sps:$4 sm:$0xff]   ;;  %v810_v6 = vld [vmem:[%s1254_s9 + $0x34] ss:$8 sps:$4 sm:$0xff]   ;;  %v812_v7 = vld [vmem:[%s1254_s9 + $0x30] ss:$8 sps:$4 sm:$0xff]  }
  0x7c   : > { %479 = vmatprep.subr.bf16.mxu0 %v804_v2  ;;  %v813_v8 = vld [vmem:[%s1254_s9 + $0x44] ss:$8 sps:$4 sm:$0xff]   ;;  %v815_v9 = vld [vmem:[%s1254_s9 + $0x40] ss:$8 sps:$4 sm:$0xff]   ;;  %v816_v10 = vld [vmem:[%s1254_s9 + $0x54] ss:$8 sps:$4 sm:$0xff]  }
  0x7d   : > { %v818_v11 = vld [vmem:[%s1254_s9 + $0x50] ss:$8 sps:$4 sm:$0xff]   ;;  %v819_v12 = vld [vmem:[%s1254_s9 + $0x64] ss:$8 sps:$4 sm:$0xff]   ;;  %v821_v16 = vld [vmem:[%s1254_s9 + $0x60] ss:$8 sps:$4 sm:$0xff]  }
  0x7e   : > { %v268_v13 = vld [vmem:[#allocation2 + $0x8] sm:$0xff]  ;;  %v270_v14 = vld [vmem:[#allocation2 + $0x18] sm:$0xff]  ;;  %v267_v35 = vld [vmem:[#allocation2] sm:$0xff]  ;;  %v308_v39 = vshrl.u32 %v307_v38, 7  ;;  %s234_s30 = scalar_lea.vmem [#allocation7], %s673_s5  ;;  %s674_s7 = sshll.u32 %s1251_s26, 5 }
  0x7f   : > { %480 = vmatpush1.bf16.msra.mxu0 %v806_v3  ;;  %v272_v15 = vpack.c.bf16 %v270_v14, %v268_v13  ;;  %v822_v17 = vld [vmem:[%s1254_s9 + $0x74] ss:$8 sps:$4 sm:$0xff]   ;;  %v824_v18 = vld [vmem:[%s1254_s9 + $0x70] ss:$8 sps:$4 sm:$0xff]   ;;  %v825_v19 = vld [vmem:[%s1254_s9 + $0x84] ss:$8 sps:$4 sm:$0xff]  }
  0x80   : > { %481 = vmatprep.subr.bf16.mxu0 %v807_v4  ;;  %v827_v20 = vld [vmem:[%s1254_s9 + $0x80] ss:$8 sps:$4 sm:$0xff]   ;;  %v828_v21 = vld [vmem:[%s1254_s9 + $0x94] ss:$8 sps:$4 sm:$0xff]   ;;  %v830_v22 = vld [vmem:[%s1254_s9 + $0x90] ss:$8 sps:$4 sm:$0xff]  }
  0x81   : > { %509 = vmatprep.mubr.bf16.mxu0 %v272_v15  ;;  %v831_v23 = vld [vmem:[%s1254_s9 + $0xa4] ss:$8 sps:$4 sm:$0xff]   ;;  %v833_v24 = vld [vmem:[%s1254_s9 + $0xa0] ss:$8 sps:$4 sm:$0xff]   ;;  %v834_v25 = vld [vmem:[%s1254_s9 + $0xb4] ss:$8 sps:$4 sm:$0xff]  }
  0x82   : > { %v836_v26 = vld [vmem:[%s1254_s9 + $0xb0] ss:$8 sps:$4 sm:$0xff]   ;;  %v837_v27 = vld [vmem:[%s1254_s9 + $0xc4] ss:$8 sps:$4 sm:$0xff]   ;;  %v839_v28 = vld [vmem:[%s1254_s9 + $0xc0] ss:$8 sps:$4 sm:$0xff]  }
  0x83   : > { %482 = vmatpush1.bf16.msra.mxu0 %v809_v5  ;;  %v840_v29 = vld [vmem:[%s1254_s9 + $0xd4] ss:$8 sps:$4 sm:$0xff]   ;;  %v842_v30 = vld [vmem:[%s1254_s9 + $0xd0] ss:$8 sps:$4 sm:$0xff]   ;;  %v843_v31 = vld [vmem:[%s1254_s9 + $0xe4] ss:$8 sps:$4 sm:$0xff]  }
  0x84   : > { %483 = vmatprep.subr.bf16.mxu0 %v810_v6  ;;  %v845_v32 = vld [vmem:[%s1254_s9 + $0xe0] ss:$8 sps:$4 sm:$0xff]   ;;  %v846_v33 = vld [vmem:[%s1254_s9 + $0xf4] ss:$8 sps:$4 sm:$0xff]   ;;  %v848_v34 = vld [vmem:[%s1254_s9 + $0xf0] ss:$8 sps:$4 sm:$0xff]  }
  0x85   : > { %v269_v36 = vld [vmem:[#allocation2 + $0x10] sm:$0xff]  ;;  %v309_v40 = vsub.s32 0, %v308_v39  ;;  %v305_v41 = vld [vmem:[%s234_s30] sm:$0x3]  ;;  %v313_v42 = vsub.s32 1, %v308_v39  ;;  %s261_s8 = scalar_lea.vmem [#allocation8], %s674_s7 }
  0x86   : > { %v271_v37 = vpack.c.bf16 %v269_v36, %v267_v35  ;;  %s541_s25 = sshll.u32 %s261_s8, 4  ;;  %s714_s27 = sshll.u32 %s1015_s15, 8  ;;  %s1295_s25 = int_to_ptr.vmem [resolvable:$true] %s541_s25 }
  0x87   : > { %484 = vmatpush1.bf16.msra.mxu0 %v812_v7  ;;  %v310_v43 = vrot.slane %v305_v41, %v309_v40  ;;  %v314_v44 = vrot.slane %v305_v41, %v313_v42  ;;  %s1300_s23 = scalar_lea.hbm %s1351_s3, %s714_s27  ;;  %s525_s15 = scalar_lea.sflag [#allocation4], %s1251_s26 }
  0x88   : > { %485 = vmatprep.subr.bf16.mxu0 %v813_v8  ;;  %s937_s11 = scalar_lea.vmem %s1295_s25, 512  ;;  %p1376_p5 = scmp.ne.s32.totalorder %s1365_s28, 0 }
  0x89   : > { %p938_p3 = scmp.ne.s32.totalorder %s1295_s25, %s937_s11  ;;  %s1033_s10 = smov [#allocation8]  }
  0x8a   : > { %s941_s20 = sshll.u32 %s1033_s10, 4  ;;  %s942_s20 = int_to_ptr.vmem [resolvable:$false] %s941_s20 }
  0x8b   : > { %486 = vmatpush1.bf16.msra.mxu0 %v815_v9  ;;  %p939_p1 = pnand %p938_p3, %p1376_p5  ;;  %s943_s1 = scalar_lea.vmem %s942_s20, 1024 }
  0x8c   : > { %487 = vmatprep.subr.bf16.mxu0 %v816_v10  ;;  %p944_p13 = scmp.lt.s32.totalorder %s1295_s25, %s942_s20  ;;  %p945_p8 = scmp.lt.s32.totalorder %s943_s1, %s937_s11 }
  0x8d   : > { %p940_p11 = pneg %p939_p1 }
  0x8e   : > { %p946_p4 = por %p945_p8, %p944_p13 }
  0x8f   : > { %488 = vmatpush1.bf16.msra.mxu0 %v818_v11 }
  0x90   : > { %489 = vmatprep.subr.bf16.mxu0 %v819_v12  ;;  %p947_p7 = pnand %p946_p4, %p940_p11 }
  0x93   : > { %490 = vmatpush1.bf16.msra.mxu0 %v821_v16 }
  0x94   : > { %491 = vmatprep.subr.bf16.mxu0 %v822_v17 }
  0x97   : > { %492 = vmatpush1.bf16.msra.mxu0 %v824_v18 }
  0x98   : > { %493 = vmatprep.subr.bf16.mxu0 %v825_v19 }
  0x9b   : > { %494 = vmatpush1.bf16.msra.mxu0 %v827_v20 }
  0x9c   : > { %495 = vmatprep.subr.bf16.mxu0 %v828_v21 }
  0x9f   : > { %496 = vmatpush1.bf16.msra.mxu0 %v830_v22 }
  0xa0   : > { %497 = vmatprep.subr.bf16.mxu0 %v831_v23 }
  0xa3   : > { %498 = vmatpush1.bf16.msra.mxu0 %v833_v24 }
  0xa4   : > { %499 = vmatprep.subr.bf16.mxu0 %v834_v25 }
  0xa7   : > { %500 = vmatpush1.bf16.msra.mxu0 %v836_v26 }
  0xa8   : > { %501 = vmatprep.subr.bf16.mxu0 %v837_v27 }
  0xab   : > { %502 = vmatpush1.bf16.msra.mxu0 %v839_v28 }
  0xac   : > { %503 = vmatprep.subr.bf16.mxu0 %v840_v29 }
  0xaf   : > { %504 = vmatpush1.bf16.msra.mxu0 %v842_v30 }
  0xb0   : > { %505 = vmatprep.subr.bf16.mxu0 %v843_v31 }
  0xb3   : > { %506 = vmatpush1.bf16.msra.mxu0 %v845_v32 }
  0xb4   : > { %507 = vmatprep.subr.bf16.mxu0 %v846_v33 }
  0xb7   : > { %508 = vmatpush1.bf16.msra.mxu0 %v848_v34 }
  0xba   : > { %510 = vmatmul.mubr.bf16.vlgmr.msra.gmra.mrb[0].mxu0 %v271_v37 }
 0x18d   : > { %v511_v45 = vpop.f32.mrb[0].mxu0 }
 0x18e   : > { %v512_v46 = vadd.f32 %v511_v45, %v310_v43  ;;  %v513_v47 = vpop.f32.mrb[1].mxu0 }
 0x18f   : > { %v514_v48 = vadd.f32 %v513_v47, %v314_v44  ;;  %v515_v49 = vpop.f32.mrb[2].mxu0 }
 0x190   : > { %520 = vst [vmem:[%s261_s8] sm:$0xff] %v512_v46  ;;  %v516_v50 = vadd.f32 %v515_v49, %v310_v43  ;;  %v517_v51 = vpop.f32.mrb[3].mxu0 }
 0x191   : > { %521 = vst [vmem:[%s261_s8 + $0x8] sm:$0xff] %v514_v48  ;;  %v518_v52 = vadd.f32 %v517_v51, %v314_v44 }
 0x192   : > { %522 = vst [vmem:[%s261_s8 + $0x10] sm:$0xff] %v516_v50 }
 0x193   : > { %523 = vst [vmem:[%s261_s8 + $0x18] sm:$0xff] %v518_v52 }
 0x194   : > { %950 = shalt.err (!%p947_p7)
}
 0x195   : > { %s951_s18 = scalar_lea.hbm %s1300_s23, 512  ;;  %s955_s6 = scalar_lea.hbm %s1351_s3, 2048 }
 0x196   : > { %p952_p9 = scmp.ne.s32.totalorder %s1300_s23, %s951_s18  ;;  %p956_p10 = scmp.lt.u32.totalorder %s1300_s23, %s1351_s3 }
 0x197   : > { %p957_p2 = scmp.lt.u32.totalorder %s955_s6, %s951_s18  ;;  %p959_p3 = scmp.lt.u32.totalorder %s951_s18, %s1300_s23 }
 0x198   : > { %p953_p12 = pnand %p952_p9, %p1376_p5 }
 0x199   : > { %p958_p0 = por %p957_p2, %p956_p10 }
 0x19a   : > { %p954_p6 = pneg %p953_p12 }
 0x19b   : > { %p960_p1 = por %p959_p3, %p958_p0 }
 0x19d   : > { %p961_p11 = pnand %p960_p1, %p954_p6 }
 0x19f   : > { %964 = shalt.err (!%p961_p11)
}
 0x1a0   : > { %s1034_s30 = smov 256   ;;  %s1035_s7 = smov 1024  }
 0x1a1   : > { %s1036_s8 = smov 16  }
 0x1a2   : > { %723 = dma.vmem_to_hbm [thread:$0]  (%p1376_p5), %s1295_s25, 512, %s1300_s23, %s525_s15, %s1034_s30, %s1035_s7, %s1036_s8  }
 0x1a3 PF: > { %p743_p13 = scmp.ge.s32.totalorder %s1023_s17, 2  ;;  %s556_s27 = sand.u32 1, %s1003_s12  }
 0x1a4   : > { %p1377_p8 = scmp.ne.s32.totalorder %s1366_s4, 0  ;;  %s557_s22 = scalar_lea.sflag [#allocation4], %s556_s27 }
 0x1a6   : > { %p737_p4 = pnand %p743_p13, %p1377_p8 }
 0x1a8   : > { %998 = dma.done.wait (!%p737_p4), %s557_s22, 512  }
 0x1a9   : > { %1000 = vsyncadd (!%p737_p4), %s557_s22, 4294966784  ;;  %s20_s17 = sadd.s32 1, %s1023_s17   ;;  %s1378_s28 = sld [smem:[#allocation12_spill]] }
 0x1aa   : > { %p17_p7 = scmp.ge.s32.totalorder %s20_s17, 6   ;;  %s1379_s12 = smov %s1007_s13 }
 0x1ab   : > { %s1380_s13 = smov %s1011_s14  ;;  %s1381_s14 = smov %s1104_s24 }
 0x1ac   : > { %s1382_s15 = smov %s1019_s16  ;;  %19 = sbr.rel (!%p17_p7) target bundleno = 9 (0x9), region = 94 }
 0x1af   : > { %s1383_s16 = smov %s1378_s28 }
 0x1b3   :  { %562 = vsyncpa [#allocation3], 1 }
 0x1b4   :  { %564 = vsyncpa [#allocation3 + $0x1], 1 }
 0x1b5   :  { %565 = vsyncpa [#allocation6], 1 }
 0x1b6   :  { %567 = vsyncpa [#allocation6 + $0x1], 1 }
 0x1b7   :  { %568 = vsyncpa [#allocation4], 1 }
 0x1b8   :  { %570 = vsyncpa [#allocation4 + $0x1], 1 }

</bundles_post_ra>
